<compile_context>
chip_gen: v5e
topology: v5e:2x2
jax: 0.10.0
libtpu: 0.0.40
codegen_flags: <defaults>
</compile_context>

<pallas_src>
import jax
import jax.numpy as jnp
from jax.experimental import pallas as pl
from jax.experimental.pallas import tpu as pltpu


# ----------------------------- Pallas kernel --------------------------------
def _affine_tanh_kernel(zr_ref, w_ref, c_ref, o_ref):
    # zr_ref : (Tb, L)  z[b, i] repeated d times per node (lane-dense)
    # w_ref  : (1,  L)  folded W[i, 0, :] flattened node-major      (resident)
    # c_ref  : (1,  L)  folded bias[i] (+ W[i, 1+i, :] if het)      (resident)
    # o_ref  : (Tb, L)  lane-dense node embeddings for this batch block
    y = zr_ref[...] * w_ref[...] + c_ref[...]       # VPU broadcast mul/add
    o_ref[...] = jnp.tanh(y).astype(o_ref.dtype)    # tanh rides the EUP slot


def _pick_batch_tile(b, L, in_bytes, out_bytes, vmem_budget=16 * 1024 * 1024):
    """Largest batch tile whose double-buffered in+out blocks fit the budget."""
    per_row = 2 * L * (in_bytes + out_bytes)              # 2x = double buffering
    align = 16 if min(in_bytes, out_bytes) < 4 else 8     # bf16 needs (16,128)
    tb_fit = max(align, (vmem_budget // per_row) // align * align)
    return b if b <= tb_fit else tb_fit


def node_embeddings(z_rep, w_flat, c_flat, out_dtype=None):
    """tanh(z_rep * w + c) over a 1-D batch grid with resident parameters."""
    b, L = z_rep.shape
    out_dtype = z_rep.dtype if out_dtype is None else out_dtype
    in_b = jnp.dtype(z_rep.dtype).itemsize
    out_b = jnp.dtype(out_dtype).itemsize
    p_b = jnp.dtype(w_flat.dtype).itemsize

    tb = _pick_batch_tile(b, L, in_b, out_b)
    grid = (pl.cdiv(b, tb),)

    # Double-buffered z-in + out blocks, plus (budgeted double-buffered) params.
    needed = 2 * tb * L * (in_b + out_b) + 4 * L * p_b
    vmem_limit = int(min(max(needed + (2 << 20), 4 << 20), 32 << 20))

    cost = pl.CostEstimate(
        flops=2 * b * L,
        transcendentals=b * L,
        bytes_accessed=b * L * (in_b + out_b) + 2 * L * p_b,
    )

    return pl.pallas_call(
        _affine_tanh_kernel,
        out_shape=jax.ShapeDtypeStruct((b, L), out_dtype),
        grid=grid,
        in_specs=[
            pl.BlockSpec((tb, L), lambda i: (i, 0)),   # batch-block of latents
            pl.BlockSpec((1, L), lambda i: (0, 0)),    # params: constant index,
            pl.BlockSpec((1, L), lambda i: (0, 0)),    #   DMA'd once, stay resident
        ],
        out_specs=pl.BlockSpec((tb, L), lambda i: (i, 0)),
        compiler_params=pltpu.CompilerParams(
            dimension_semantics=("parallel",),         # dual-TC sharding on v7x
            vmem_limit_bytes=vmem_limit,               # explicit (v5e default = 16 MiB)
        ),
        cost_estimate=cost,
    )(z_rep, w_flat, c_flat)


# ------------------------------ Module wrapper -------------------------------
def init_params(key, input_dim: int, decoder_dim: int, het_encoding: bool):
    """Deterministic init of the per-node Linear(feat_dim, decoder_dim) stack."""
    feat_dim = input_dim + 1 if het_encoding else 1
    kw, kb = jax.random.split(key)
    bound = 1.0 / jnp.sqrt(feat_dim)
    weights = jax.random.uniform(
        kw, (input_dim, feat_dim, decoder_dim), jnp.float32, -bound, bound
    )
    biases = jax.random.uniform(
        kb, (input_dim, decoder_dim), jnp.float32, -bound, bound
    )
    return weights, biases


def fold_params(weights, biases, het_encoding: bool):
    """Hoisted, parameter-only fold.  Call once at model build, not per forward.

    Node i's input is [z[:, i], e_i] (one-hot) so the per-node Linear collapses
    to an affine map of the scalar z[:, i]:
        het : tanh(z[:, i] * W[i, 0, :] + W[i, 1+i, :] + b[i])
        else: tanh(z[:, i] * W[i, 0, :] + b[i])
    Returns lane-dense flattened (1, n*d) parameter rows.
    """
    n, _, d = weights.shape
    w0 = weights[:, 0, :]                                   # (n, d)
    if het_encoding:
        idx = jnp.arange(n)
        cst = biases + weights[idx, 1 + idx, :]             # (n, d)
    else:
        cst = biases
    return w0.reshape(1, n * d), cst.reshape(1, n * d)


def graph_input_processor_homo_forward(
    z, adj, folded_params, *, use_pallas=None, out_dtype=None
):
    w_flat, c_flat = folded_params
    b, n = z.shape
    L = w_flat.shape[-1]
    d = L // n
    out_dtype = z.dtype if out_dtype is None else out_dtype

    if use_pallas is None:
        # Below ~1e5 output elements the kernel is pure pallas_call overhead.
        use_pallas = b * L >= 100_000

    if use_pallas:
        # Lane-dense latent: each node scalar repeated d times along the lane
        # axis, matching the flattened (node-major) parameter layout.
        z_rep = jnp.repeat(z, d, axis=1)                         # (b, L)
        emb = node_embeddings(z_rep, w_flat, c_flat, out_dtype)  # (b, L)
    else:
        # Tiny-shape fallback: plain jnp, XLA fuses with producers/consumers.
        emb = jnp.tanh(z[..., None] * w_flat.reshape(n, d) + c_flat.reshape(n, d))
        emb = emb.reshape(b, L).astype(out_dtype)

    # torch: stack(dim=1) + flatten(0,1).  emb is already batch/node-major, so
    # the (b*n, d) result is a free contiguous reshape.
    b_z_out = emb.reshape(b * n, d)

    # TODO(synk): adj.nonzero() / dgl.graph / dgl.batch build dynamically shaped
    # sparse graph objects with no static-shape Pallas equivalent.  We return
    # the (lazily) batched dense adjacency and the per-graph dense edge weights
    # (n*n, zero for non-edges); the per-batch repeat of edge weights is
    # deferred to the consumer to avoid materializing a b*n^2 array.
    b_adj = jnp.broadcast_to(adj, (b, n, n))
    edge_weight = adj.reshape(-1)
    return b_z_out, b_adj, edge_weight


# --------------------------------- Demo --------------------------------------
if __name__ == "__main__":
    key = jax.random.PRNGKey(0)
    k_z, k_adj, k_par = jax.random.split(key, 3)

    b_size = 2
    input_dim = 8        # == n_nodes
    decoder_dim = 32     # L = n*d = 256 -> lane-dense (multiple of 128)
    het_encoding = True

    z = jax.random.normal(k_z, (b_size, input_dim), jnp.float32)
    adj = (jax.random.uniform(k_adj, (input_dim, input_dim)) > 0.5).astype(jnp.float32)

    weights, biases = init_params(k_par, input_dim, decoder_dim, het_encoding)
    folded = fold_params(weights, biases, het_encoding)   # hoisted, once

    # Force the Pallas path to exercise the kernel at demo shapes.
    b_z_out, b_adj, edge_weight = graph_input_processor_homo_forward(
        z, adj, folded, use_pallas=True
    )
    jax.block_until_ready((b_z_out, b_adj, edge_weight))

    # Auto-gated fallback (tiny shape -> plain jnp) must agree with the kernel.
    b_z_fb, _, _ = graph_input_processor_homo_forward(z, adj, folded)
    jax.block_until_ready(b_z_fb)

    # Pure-JAX reference of the original (full one-hot + per-node matmul) path.
    b_z_ref = z[..., None]
    eye = jnp.eye(input_dim, dtype=z.dtype)
    b_z_ref = jnp.concatenate(
        [b_z_ref, jnp.broadcast_to(eye, (b_size, input_dim, input_dim))], axis=-1
    )
    ref = jnp.tanh(
        jnp.einsum("bnf,nfd->bnd", b_z_ref, weights) + biases[None]
    ).reshape(b_size * input_dim, decoder_dim)

    assert b_z_out.shape == (b_size * input_dim, decoder_dim)
    assert b_adj.shape == (b_size, input_dim, input_dim)
    assert edge_weight.shape == (input_dim * input_dim,)
    assert jnp.allclose(b_z_out, ref, atol=1e-5, rtol=1e-5), "kernel vs reference"
    assert jnp.allclose(b_z_fb, ref, atol=1e-5, rtol=1e-5), "fallback vs reference"

    print("KERNEL_OK")
</pallas_src>

<mosaic_0001>
module attributes {stable_mosaic.version = 11 : i64} {
  func.func @_affine_tanh_kernel(%arg0: i32, %arg1: memref<2x256xf32, #tpu.memory_space<vmem>>, %arg2: memref<1x256xf32, #tpu.memory_space<vmem>>, %arg3: memref<1x256xf32, #tpu.memory_space<vmem>>, %arg4: memref<2x256xf32, #tpu.memory_space<vmem>>) attributes {dimension_semantics = [#tpu.dimension_semantics<parallel>], iteration_bounds = array<i64: 1>, scalar_prefetch = 0 : i64, scratch_operands = 0 : i64, tpu.core_type = #tpu.core_type<tc>, window_params = [{transform_indices = @transform_0, window_bounds = array<i64: 2, 256>}, {pipeline_mode = #tpu.pipeline_mode<synchronous>, transform_indices = @transform_1, window_bounds = array<i64: 1, 256>}, {pipeline_mode = #tpu.pipeline_mode<synchronous>, transform_indices = @transform_2, window_bounds = array<i64: 1, 256>}, {transform_indices = @transform_3, window_bounds = array<i64: 2, 256>}]} {
    %c0 = arith.constant 0 : index
    %c0_0 = arith.constant 0 : index
    %0 = vector.load %arg1[%c0, %c0_0] : memref<2x256xf32, #tpu.memory_space<vmem>>, vector<2x256xf32>
    %c0_1 = arith.constant 0 : index
    %c0_2 = arith.constant 0 : index
    %1 = vector.load %arg2[%c0_1, %c0_2] : memref<1x256xf32, #tpu.memory_space<vmem>>, vector<1x256xf32>
    %2 = vector.broadcast %1 : vector<1x256xf32> to vector<2x256xf32>
    %3 = arith.mulf %0, %2 : vector<2x256xf32>
    %c0_3 = arith.constant 0 : index
    %c0_4 = arith.constant 0 : index
    %4 = vector.load %arg3[%c0_3, %c0_4] : memref<1x256xf32, #tpu.memory_space<vmem>>, vector<1x256xf32>
    %5 = vector.broadcast %4 : vector<1x256xf32> to vector<2x256xf32>
    %6 = arith.addf %3, %5 : vector<2x256xf32>
    %7 = math.tanh %6 : vector<2x256xf32>
    %c0_5 = arith.constant 0 : index
    %c0_6 = arith.constant 0 : index
    %8 = vector.load %arg4[%c0_5, %c0_6] : memref<2x256xf32, #tpu.memory_space<vmem>>, vector<2x256xf32>
    tpu.vector_store %arg4[%c0_5, %c0_6], %7 {strides = array<i32>} : memref<2x256xf32, #tpu.memory_space<vmem>>, vector<2x256xf32>,
    return
  }
  func.func @transform_0(%arg0: i32) -> (i32, i32) {
    %c0_i32 = arith.constant 0 : i32
    %c0_i32_0 = arith.constant 0 : i32
    return %arg0, %c0_i32 : i32, i32
  }
  func.func @transform_1(%arg0: i32) -> (i32, i32) {
    %c0_i32 = arith.constant 0 : i32
    %c0_i32_0 = arith.constant 0 : i32
    %c0_i32_1 = arith.constant 0 : i32
    return %c0_i32, %c0_i32_0 : i32, i32
  }
  func.func @transform_2(%arg0: i32) -> (i32, i32) {
    %c0_i32 = arith.constant 0 : i32
    %c0_i32_0 = arith.constant 0 : i32
    %c0_i32_1 = arith.constant 0 : i32
    return %c0_i32, %c0_i32_0 : i32, i32
  }
  func.func @transform_3(%arg0: i32) -> (i32, i32) {
    %c0_i32 = arith.constant 0 : i32
    %c0_i32_0 = arith.constant 0 : i32
    return %arg0, %c0_i32 : i32, i32
  }
}

</mosaic_0001>

<bundles_post_ra>
// kernel: tpu_custom_call.1
= control target key start
LH: loop header
LB: loop body
LE: loop exit
PB: predicated region body
PF: predicated region fallthrough
CT: control target
= control target key end

     0   :  { %8 = vsyncpa [#allocation3], 0  ;;  %s238_s0 = inlined_call_operand.hbm [shape: f32[2,256], index: 0, kind: input, shape index: {}]   ;;  %s239_s1 = inlined_call_operand.hbm [shape: f32[1,256], index: 1, kind: input, shape index: {}]   ;;  %s240_s2 = inlined_call_operand.hbm [shape: f32[1,256], index: 2, kind: input, shape index: {}]   ;;  %s241_s3 = inlined_call_operand.hbm [shape: f32[2,256], index: 3, kind: output, shape index: {}]  }
   0x1   :  { %9 = vsyncpa [#allocation6], 0  ;;  %s27_s14 = sshll.u32 %s239_s1, 4  ;;  %s28_s14 = int_to_ptr.hbm [resolvable:$true] %s27_s14 }
   0x2   :  { %10 = vsyncpa [#allocation4], 0  ;;  %s202_s15 = smov [#allocation5]   ;;  %s16_s19 = sshll.u32 %s238_s0, 4  ;;  %s17_s19 = int_to_ptr.hbm [resolvable:$true] %s16_s19 }
   0x3   :  { %s29_s16 = sshll.u32 %s202_s15, 4  ;;  %s203_s20 = smov [#allocation2]   ;;  %s30_s16 = int_to_ptr.vmem [resolvable:$true] %s29_s16 }
   0x4   :  { %32 = dma.hbm_to_vmem [thread:$0]  %s28_s14, 32, %s30_s16, [#allocation6]  }
   0x5   :  { %s18_s21 = sshll.u32 %s203_s20, 4  ;;  %s38_s24 = sshll.u32 %s240_s2, 4  ;;  %s19_s21 = int_to_ptr.vmem [resolvable:$true] %s18_s21  ;;  %s39_s24 = int_to_ptr.hbm [resolvable:$true] %s38_s24 }
   0x6   :  { %21 = dma.hbm_to_vmem [thread:$0]  %s17_s19, 64, %s19_s21, [#allocation3]  }
   0x7   :  { %s204_s1 = smov [#allocation7]  }
   0x8   :  { %s40_s25 = sshll.u32 %s204_s1, 4  ;;  %s41_s25 = int_to_ptr.vmem [resolvable:$true] %s40_s25 }
   0x9   :  { %43 = dma.hbm_to_vmem [thread:$0]  %s39_s24, 32, %s41_s25, [#allocation6]  }
   0xa   :  { %196 = dma.done.wait [#allocation3], 64  }
   0xb   :  { %197 = vsyncadd [#allocation3], 4294967232 }
   0xc   :  { %198 = dma.done.wait [#allocation6], 64  }
   0xd   :  { %199 = vsyncadd [#allocation6], 4294967232  ;;  %v57_v0 = vld [vmem:[#allocation5] sm:$0x3]  ;;  %v66_v1 = vld [vmem:[#allocation7] sm:$0x3] }
   0xe   :  { %v59_v2 = vperm.slane %v57_v0, 0  ;;  %v60_v3 = vperm.slane %v57_v0, 1  ;;  %v68_v4 = vperm.slane %v66_v1, 0  ;;  %v69_v5 = vperm.slane %v66_v1, 1  ;;  %v56_v6 = vld [vmem:[#allocation2] sm:$0xf] }
   0xf   :  { %vm62_vm0 = vcmask 1041408   ;;  %s205_s0 = smov [#allocation8]   ;;  %s83_s28 = sshll.u32 %s241_s3, 4  ;;  %s84_s28 = int_to_ptr.hbm [resolvable:$true] %s83_s28 }
  0x10   :  { %v61_v7 = vrot.slane %v60_v3, 6  ;;  %v70_v8 = vrot.slane %v69_v5, 6  ;;  %s81_s2 = sshll.u32 %s205_s0, 4  ;;  %s82_s2 = int_to_ptr.vmem [resolvable:$true] %s81_s2 }
  0x12   :  { %v63_v9 = vsel %vm62_vm0, %v59_v2, %v61_v7  ;;  %v71_v10 = vsel %vm62_vm0, %v68_v4, %v70_v8 }
  0x13   :  { %v65_v11 = vmul.f32 %v63_v9, %v56_v6 }
  0x15   :  { %v73_v12 = vadd.f32 %v71_v10, %v65_v11 }
  0x17   :  { %98 = vtanh.f32 %v73_v12 }
  0x1d   :  { %v99_v13 = vpop.eup %98 }
  0x1e   :  { %75 = vst [vmem:[#allocation8] sm:$0xf] %v99_v13 }
  0x1f   :  { %86 = dma.vmem_to_hbm [thread:$0]  %s82_s2, 64, %s84_s28, [#allocation4]  }
  0x20   :  { %200 = dma.done.wait [#allocation4], 64  }
  0x21   :  { %201 = vsyncadd [#allocation4], 4294967232 }
  0x22   :  { %91 = vsyncpa [#allocation3], 1 }
  0x23   :  { %92 = vsyncpa [#allocation6], 1 }
  0x24   :  { %93 = vsyncpa [#allocation4], 1 }

</bundles_post_ra>
